<compile_context>
chip_gen: v7x
topology: tpu7x:2x2x1
jax: 0.10.0
libtpu: 0.0.40
codegen_flags: <defaults>
</compile_context>

<pallas_src>
import functools

import jax
import jax.numpy as jnp
import numpy as np
from jax import lax
from jax.experimental import pallas as pl
from jax.experimental.pallas import tpu as pltpu


def _round_up(x: int, m: int) -> int:
    return ((x + m - 1) // m) * m


def _factor_predictor_kernel(e_ref, p_ref, o_ref, *, N, K, Hpad, Kpad):
    """Fused forward for one block of BB batch elements.

    e_ref: (BB, N, Hpad)  feature-padded hidden features; lane H holds 1.0
                          (constant-ones lane used to fold the head biases).
    p_ref: (Hpad, Hpad + Kpad + 128) packed parameters:
             cols [0, Hpad)         : Wk.T (zero-padded)
             cols [Hpad, Hpad+Kpad) : (q_hat @ Wk).T
             cols [Hpad+Kpad, +2)   : composed value->(mu, sigma) weights,
                                      composed biases in row H.
    o_ref: (BB, 2, K)  row 0 = mu_prior, row 1 = sigma_prior.
    """
    BB = e_ref.shape[0]
    e = e_ref[...].reshape(BB * N, Hpad)

    # Single MXU pass: [ k | s_raw | ve_mu ve_sig ] for every token in the block.
    proj = jnp.dot(e, p_ref[...], preferred_element_type=jnp.float32)

    k = proj[:, :Hpad]                               # (BB*N, Hpad)
    s = proj[:, Hpad:Hpad + Kpad]                    # (BB*N, Kpad)
    ve = proj[:, Hpad + Kpad:Hpad + Kpad + 2]        # (BB*N, 2)

    # Cosine similarity: q pre-normalized wrapper-side; scale score rows by
    # 1/||k_n|| (K lanes of work instead of H lanes on k itself).
    ksq = jnp.sum(k * k, axis=-1, keepdims=True)     # (BB*N, 1)
    s = s * lax.rsqrt(ksq)

    # softmax(relu(s)) over tokens.  relu'd cosine sims lie in [0, 1] ->
    # exp never overflows, no max-subtraction needed.
    ex = jnp.exp(jnp.maximum(s, 0.0))                # (BB*N, Kpad)

    ex3 = ex.reshape(BB, N, Kpad)
    ve3 = ve.reshape(BB, N, 2)

    # Token reductions per batch element; softmax normalization deferred to a
    # single reciprocal applied after the weighted sums (mathematically equal).
    denom = jnp.sum(ex3, axis=1, keepdims=True)                       # (BB, 1, Kpad)
    mu_num = jnp.sum(ex3 * ve3[:, :, 0:1], axis=1, keepdims=True)     # (BB, 1, Kpad)
    sg_num = jnp.sum(ex3 * ve3[:, :, 1:2], axis=1, keepdims=True)     # (BB, 1, Kpad)

    r = pl.reciprocal(denom, approx=False)           # EUP; full precision
    mu = mu_num * r
    sg = sg_num * r
    # Numerically-stable softplus for sigma.
    sigma = jnp.maximum(sg, 0.0) + jnp.log1p(jnp.exp(-jnp.abs(sg)))

    o_ref[:, 0:1, :] = mu[:, :, :K]
    o_ref[:, 1:2, :] = sigma[:, :, :K]


def _pack_params(params, H, K, Hpad, Kpad, dtype):
    """Precompose + 128-lane-align all 9 parameters into one (Hpad, Cpad) buffer."""
    q = params['q'].astype(jnp.float32)
    wk = params['wk'].astype(jnp.float32)
    wv = params['wv'].astype(jnp.float32)
    wh = params['wh'].astype(jnp.float32)
    bh = params['bh'].astype(jnp.float32)
    wmu, bmu = params['wmu'].astype(jnp.float32), params['bmu'].astype(jnp.float32)
    wsig, bsig = params['wsig'].astype(jnp.float32), params['bsig'].astype(jnp.float32)

    # Normalize q once (constant parameter) and compose it with Wk so the raw
    # cosine numerators come straight out of the single fused matmul.
    q_hat = q / jnp.linalg.norm(q, axis=-1, keepdims=True)          # (K, H)
    q_eff_t = wk.T @ q_hat.T                                        # (H, K)

    # Collapse v_layer -> (attention sum) -> h_layer -> mean/std heads.
    # Valid: no nonlinearity after h_layer in FactorPredictor.
    w_ve_mu = (wmu @ wh @ wv).T                                     # (H, 1)
    w_ve_sig = (wsig @ wh @ wv).T                                   # (H, 1)
    b_mu_eff = (bh @ wmu.T + bmu)[0, 0]
    b_sig_eff = (bh @ wsig.T + bsig)[0, 0]

    Cpad = Hpad + Kpad + 128
    p = jnp.zeros((Hpad, Cpad), jnp.float32)
    p = p.at[:H, :H].set(wk.T)
    p = p.at[:H, Hpad:Hpad + K].set(q_eff_t)
    p = p.at[:H, Hpad + Kpad].set(w_ve_mu[:, 0])
    p = p.at[:H, Hpad + Kpad + 1].set(w_ve_sig[:, 0])
    # Row H is contracted against the constant-ones lane of e -> carries biases.
    p = p.at[H, Hpad + Kpad].set(b_mu_eff)
    p = p.at[H, Hpad + Kpad + 1].set(b_sig_eff)
    return p.astype(dtype)


def factor_predictor(e, params, *, matmul_dtype=jnp.float32, block_batch=None):
    """e: (B, N, H) -> (mu_prior (B, K), sigma_prior (B, K)).

    matmul_dtype: jnp.float32 (exact; all chips) or jnp.bfloat16 (recommended
      on v6e/v7x: halves HBM traffic for e, 2x MXU; accumulation stays f32).
    """
    B, N, H = e.shape
    K = params['q'].shape[0]

    Hpad = _round_up(H + 1, 128)   # +1: constant-ones lane carrying the biases
    Kpad = _round_up(K, 128)
    Cpad = Hpad + Kpad + 128

    esize = jnp.dtype(matmul_dtype).itemsize
    if block_batch is None:
        # ~2 MiB of `e` per pipeline buffer: enough rows to amortize per-step
        # overhead, small enough for v5e's 16 MiB scoped default and v7x's
        # 64 MiB physical VMEM even with double buffering.
        block_batch = max(1, (2 << 20) // (N * Hpad * esize))
    BB = max(1, min(B, block_batch))
    nb = pl.cdiv(B, BB)
    B_pad = nb * BB

    # Pad features to Hpad (+ ones lane) and batch to a multiple of BB.
    # Padded batch rows produce garbage (isolated per batch element) and are
    # sliced off below; padded feature lanes are exactly zero.
    e_pad = jnp.zeros((B_pad, N, Hpad), jnp.float32)
    e_pad = e_pad.at[:B, :, :H].set(e.astype(jnp.float32))
    e_pad = e_pad.at[:, :, H].set(1.0)
    e_pad = e_pad.astype(matmul_dtype)

    p = _pack_params(params, H, K, Hpad, Kpad, matmul_dtype)

    e_blk = BB * N * Hpad * esize
    out_blk = BB * 2 * K * 4
    proj_blk = BB * N * Cpad * 4
    vmem_limit = int(min(max(2 * e_blk + 2 * out_blk + proj_blk
                             + p.size * esize + (4 << 20), 16 << 20), 40 << 20))

    cost = pl.CostEstimate(
        flops=2 * B_pad * N * Hpad * Cpad + 8 * B_pad * N * Kpad,
        transcendentals=B_pad * N * (Kpad + 1) + 3 * B_pad * Kpad,
        bytes_accessed=e_pad.size * esize + p.size * esize + B_pad * 2 * K * 4,
    )

    out = pl.pallas_call(
        functools.partial(_factor_predictor_kernel, N=N, K=K, Hpad=Hpad, Kpad=Kpad),
        out_shape=jax.ShapeDtypeStruct((B_pad, 2, K), jnp.float32),
        grid=(nb,),
        in_specs=[
            pl.BlockSpec((BB, N, Hpad), lambda i: (i, 0, 0)),
            pl.BlockSpec((Hpad, Cpad), lambda i: (0, 0)),   # constant block
        ],
        out_specs=pl.BlockSpec((BB, 2, K), lambda i: (i, 0, 0)),
        compiler_params=pltpu.CompilerParams(
            dimension_semantics=("parallel",),
            vmem_limit_bytes=vmem_limit),
        cost_estimate=cost,
    )(e_pad, p)

    return out[:B, 0, :], out[:B, 1, :]


def factor_predictor_ref(e, p):
    """Plain-JAX reference mirroring the PyTorch module exactly (unfused)."""
    k = e @ p['wk'].T
    v = e @ p['wv'].T
    q = p['q']
    q_norm = jnp.linalg.norm(q, axis=-1)
    k_norm = jnp.linalg.norm(k, axis=-1)
    s = jnp.einsum('bnh,kh->bnk', k, q) / q_norm / k_norm[..., None]
    a = jax.nn.softmax(jax.nn.relu(s), axis=1)
    h = jnp.einsum('btn,bte->bne', a, v)
    hp = h @ p['wh'].T + p['bh'][0]
    mu = (hp @ p['wmu'].T + p['bmu'][0]).squeeze(-1)
    sigma = jax.nn.softplus(hp @ p['wsig'].T + p['bsig'][0]).squeeze(-1)
    return mu, sigma


if __name__ == "__main__":
    # H = hidden size, K = num factors (attention heads), P = h_prior_size
    B, N, H, K, P = 2, 8, 32, 4, 16

    key = jax.random.PRNGKey(0)
    ks = jax.random.split(key, 10)
    e = jax.random.normal(ks[0], (B, N, H), jnp.float32)

    params = {
        'q':    jax.random.normal(ks[1], (K, H), jnp.float32),                   # attention.q
        'wk':   jax.random.normal(ks[2], (H, H), jnp.float32) / jnp.sqrt(H),     # k_layer.weight
        'wv':   jax.random.normal(ks[3], (H, H), jnp.float32) / jnp.sqrt(H),     # v_layer.weight
        'wh':   jax.random.normal(ks[4], (P, H), jnp.float32) / jnp.sqrt(H),     # h_layer.weight
        'bh':   jax.random.normal(ks[5], (1, P), jnp.float32) * 0.1,             # h_layer.bias
        'wmu':  jax.random.normal(ks[6], (1, P), jnp.float32) / jnp.sqrt(P),     # mean_layer.weight
        'bmu':  jax.random.normal(ks[7], (1, 1), jnp.float32) * 0.1,             # mean_layer.bias
        'wsig': jax.random.normal(ks[8], (1, P), jnp.float32) / jnp.sqrt(P),     # std_layer[0].weight
        'bsig': jax.random.normal(ks[9], (1, 1), jnp.float32) * 0.1,             # std_layer[0].bias
    }

    mu_r, sigma_r = factor_predictor_ref(e, params)

    # f32 path (exact; all chip generations).
    mu, sigma = factor_predictor(e, params)
    jax.block_until_ready((mu, sigma))
    np.testing.assert_allclose(np.asarray(mu), np.asarray(mu_r), rtol=2e-4, atol=1e-5)
    np.testing.assert_allclose(np.asarray(sigma), np.asarray(sigma_r), rtol=2e-4, atol=1e-5)

    # bf16 matmul-operand path (v6e/v7x fast path; f32 accumulation) — loose check.
    mu_b, sigma_b = factor_predictor(e, params, matmul_dtype=jnp.bfloat16)
    jax.block_until_ready((mu_b, sigma_b))
    np.testing.assert_allclose(np.asarray(mu_b), np.asarray(mu_r), rtol=5e-2, atol=5e-2)
    np.testing.assert_allclose(np.asarray(sigma_b), np.asarray(sigma_r), rtol=5e-2, atol=5e-2)

    print("KERNEL_OK")
</pallas_src>

<mosaic_0001>
module attributes {stable_mosaic.version = 11 : i64} {
  func.func @_factor_predictor_kernel(%arg0: i32, %arg1: memref<2x8x128xf32, #tpu.memory_space<vmem>>, %arg2: memref<128x384xf32, #tpu.memory_space<vmem>>, %arg3: memref<2x2x4xf32, #tpu.memory_space<vmem>>) attributes {dimension_semantics = [#tpu.dimension_semantics<parallel>], iteration_bounds = array<i64: 1>, scalar_prefetch = 0 : i64, scratch_operands = 0 : i64, tpu.core_type = #tpu.core_type<tc>, window_params = [{transform_indices = @transform_0, window_bounds = array<i64: 2, 8, 128>}, {pipeline_mode = #tpu.pipeline_mode<synchronous>, transform_indices = @transform_1, window_bounds = array<i64: 128, 384>}, {transform_indices = @transform_2, window_bounds = array<i64: 2, 2, 4>}]} {
    %c0 = arith.constant 0 : index
    %c0_0 = arith.constant 0 : index
    %c0_1 = arith.constant 0 : index
    %0 = vector.load %arg1[%c0, %c0_0, %c0_1] : memref<2x8x128xf32, #tpu.memory_space<vmem>>, vector<2x8x128xf32>
    %1 = vector.shape_cast %0 : vector<2x8x128xf32> to vector<16x128xf32>
    %c0_2 = arith.constant 0 : index
    %c0_3 = arith.constant 0 : index
    %2 = vector.load %arg2[%c0_2, %c0_3] : memref<128x384xf32, #tpu.memory_space<vmem>>, vector<128x384xf32>
    %cst = arith.constant dense<0.000000e+00> : vector<16x384xf32>
    %3 = tpu.matmul %1, %2, %cst {dimension_numbers = #tpu.dot_dimension_numbers<[1], [0], [0], [1], [0, 0, 1, 1], [], []>} : vector<16x128xf32>, vector<128x384xf32>, vector<16x384xf32> -> vector<16x384xf32>
    %4 = vector.extract_strided_slice %3 {offsets = [0, 0], sizes = [16, 128], strides = [1, 1]} : vector<16x384xf32> to vector<16x128xf32>
    %5 = vector.extract_strided_slice %3 {offsets = [0, 128], sizes = [16, 128], strides = [1, 1]} : vector<16x384xf32> to vector<16x128xf32>
    %6 = vector.extract_strided_slice %3 {offsets = [0, 256], sizes = [16, 2], strides = [1, 1]} : vector<16x384xf32> to vector<16x2xf32>
    %7 = arith.mulf %4, %4 : vector<16x128xf32>
    %cst_4 = arith.constant dense<0.000000e+00> : vector<16xf32>
    %8 = vector.multi_reduction <add>, %7, %cst_4 [1] : vector<16x128xf32> to vector<16xf32>
    %9 = vector.shape_cast %8 : vector<16xf32> to vector<16x1xf32>
    %10 = math.rsqrt %9 : vector<16x1xf32>
    %11 = vector.broadcast %10 : vector<16x1xf32> to vector<16x128xf32>
    %12 = arith.mulf %5, %11 : vector<16x128xf32>
    %cst_5 = arith.constant 0.000000e+00 : f32
    %13 = vector.broadcast %cst_5 : f32 to vector<16x128xf32>
    %14 = arith.maximumf %12, %13 : vector<16x128xf32>
    %15 = math.exp %14 : vector<16x128xf32>
    %16 = vector.shape_cast %15 : vector<16x128xf32> to vector<2x8x128xf32>
    %17 = vector.shape_cast %6 : vector<16x2xf32> to vector<2x8x2xf32>
    %cst_6 = arith.constant dense<0.000000e+00> : vector<2x128xf32>
    %18 = vector.multi_reduction <add>, %16, %cst_6 [1] : vector<2x8x128xf32> to vector<2x128xf32>
    %19 = vector.shape_cast %18 : vector<2x128xf32> to vector<2x1x128xf32>
    %20 = vector.extract_strided_slice %17 {offsets = [0, 0, 0], sizes = [2, 8, 1], strides = [1, 1, 1]} : vector<2x8x2xf32> to vector<2x8x1xf32>
    %21 = vector.broadcast %20 : vector<2x8x1xf32> to vector<2x8x128xf32>
    %22 = arith.mulf %16, %21 : vector<2x8x128xf32>
    %cst_7 = arith.constant dense<0.000000e+00> : vector<2x128xf32>
    %23 = vector.multi_reduction <add>, %22, %cst_7 [1] : vector<2x8x128xf32> to vector<2x128xf32>
    %24 = vector.shape_cast %23 : vector<2x128xf32> to vector<2x1x128xf32>
    %25 = vector.extract_strided_slice %17 {offsets = [0, 0, 1], sizes = [2, 8, 1], strides = [1, 1, 1]} : vector<2x8x2xf32> to vector<2x8x1xf32>
    %26 = vector.broadcast %25 : vector<2x8x1xf32> to vector<2x8x128xf32>
    %27 = arith.mulf %16, %26 : vector<2x8x128xf32>
    %cst_8 = arith.constant dense<0.000000e+00> : vector<2x128xf32>
    %28 = vector.multi_reduction <add>, %27, %cst_8 [1] : vector<2x8x128xf32> to vector<2x128xf32>
    %29 = vector.shape_cast %28 : vector<2x128xf32> to vector<2x1x128xf32>
    %30 = tpu.reciprocal %19 : vector<2x1x128xf32> -> vector<2x1x128xf32>
    %31 = arith.mulf %24, %30 : vector<2x1x128xf32>
    %32 = arith.mulf %29, %30 : vector<2x1x128xf32>
    %cst_9 = arith.constant 0.000000e+00 : f32
    %33 = vector.broadcast %cst_9 : f32 to vector<2x1x128xf32>
    %34 = arith.maximumf %32, %33 : vector<2x1x128xf32>
    %35 = math.absf %32 : vector<2x1x128xf32>
    %cst_10 = arith.constant 0.000000e+00 : f32
    %36 = vector.broadcast %cst_10 : f32 to vector<2x1x128xf32>
    %37 = arith.subf %36, %35 : vector<2x1x128xf32>
    %38 = math.exp %37 : vector<2x1x128xf32>
    %39 = math.log1p %38 : vector<2x1x128xf32>
    %40 = arith.addf %34, %39 : vector<2x1x128xf32>
    %41 = vector.extract_strided_slice %31 {offsets = [0, 0, 0], sizes = [2, 1, 4], strides = [1, 1, 1]} : vector<2x1x128xf32> to vector<2x1x4xf32>
    %c0_11 = arith.constant 0 : index
    %c0_12 = arith.constant 0 : index
    %c0_13 = arith.constant 0 : index
    %42 = vector.load %arg3[%c0_11, %c0_12, %c0_13] : memref<2x2x4xf32, #tpu.memory_space<vmem>>, vector<2x1x4xf32>
    tpu.vector_store %arg3[%c0_11, %c0_12, %c0_13], %41 {strides = array<i32>} : memref<2x2x4xf32, #tpu.memory_space<vmem>>, vector<2x1x4xf32>,
    %43 = vector.extract_strided_slice %40 {offsets = [0, 0, 0], sizes = [2, 1, 4], strides = [1, 1, 1]} : vector<2x1x128xf32> to vector<2x1x4xf32>
    %c0_14 = arith.constant 0 : index
    %c1 = arith.constant 1 : index
    %c0_15 = arith.constant 0 : index
    %44 = vector.load %arg3[%c0_14, %c1, %c0_15] : memref<2x2x4xf32, #tpu.memory_space<vmem>>, vector<2x1x4xf32>
    tpu.vector_store %arg3[%c0_14, %c1, %c0_15], %43 {strides = array<i32>} : memref<2x2x4xf32, #tpu.memory_space<vmem>>, vector<2x1x4xf32>,
    return
  }
  func.func @transform_0(%arg0: i32) -> (i32, i32, i32) {
    %c0_i32 = arith.constant 0 : i32
    %c0_i32_0 = arith.constant 0 : i32
    %c0_i32_1 = arith.constant 0 : i32
    return %arg0, %c0_i32, %c0_i32_0 : i32, i32, i32
  }
  func.func @transform_1(%arg0: i32) -> (i32, i32) {
    %c0_i32 = arith.constant 0 : i32
    %c0_i32_0 = arith.constant 0 : i32
    %c0_i32_1 = arith.constant 0 : i32
    return %c0_i32, %c0_i32_0 : i32, i32
  }
  func.func @transform_2(%arg0: i32) -> (i32, i32, i32) {
    %c0_i32 = arith.constant 0 : i32
    %c0_i32_0 = arith.constant 0 : i32
    %c0_i32_1 = arith.constant 0 : i32
    return %arg0, %c0_i32, %c0_i32_0 : i32, i32, i32
  }
}

</mosaic_0001>

<bundles_post_ra>
// kernel: tpu_custom_call.1
= control target key start
LH: loop header
LB: loop body
LE: loop exit
PB: predicated region body
PF: predicated region fallthrough
CT: control target
= control target key end

     0   :  { %7 = vsyncpa [#allocation3], 0  ;;  %s673_s0 = inlined_call_operand.hbm [shape: f32[2,8,128], index: 0, kind: input, shape index: {}]   ;;  %s674_s1 = inlined_call_operand.hbm [shape: f32[128,384], index: 1, kind: input, shape index: {}]   ;;  %s675_s2 = inlined_call_operand.hbm [shape: f32[2,2,4], index: 2, kind: output, shape index: {}]  }
   0x1   :  { %8 = vsyncpa [#allocation6], 0 }
   0x2   :  { %9 = vsyncpa [#allocation4], 0  ;;  %s600_s9 = smov [#allocation2]   ;;  %s528_s13 = scalar_lea.hbm %s673_s0, 256 }
   0x3   :  { %s15_s10 = sshll.u32 %s600_s9, 4  ;;  %p529_p0 = scmp.ne.s32.totalorder %s673_s0, %s528_s13  ;;  %s16_s10 = int_to_ptr.vmem [resolvable:$true] %s15_s10 }
   0x4   :  { %p532_p1 = scmp.lt.u32.totalorder %s528_s13, %s673_s0 }
   0x6   :  { %p534_p2 = pnand %p532_p1, %p529_p0 }
   0x8   :  { %537 = shalt.err (!%p534_p2)
}
   0x9   :  { %s538_s18 = scalar_lea.vmem %s16_s10, 256  ;;  %p543_p4 = scmp.lt.s32.totalorder %s16_s10, %s16_s10 }
   0xa   :  { %p539_p3 = scmp.ne.s32.totalorder %s16_s10, %s538_s18  ;;  %p544_p5 = scmp.lt.s32.totalorder %s538_s18, %s538_s18 }
   0xc   :  { %p545_p6 = por %p544_p5, %p543_p4 }
   0xe   :  { %p546_p7 = pnand %p545_p6, %p539_p3 }
  0x10   :  { %549 = shalt.err (!%p546_p7)
}
  0x11   :  { %s601_s19 = smov 128   ;;  %s602_s20 = smov 8  }
  0x12   :  { %21 = dma.hbm_to_vmem [thread:$0]  %s673_s0, 256, %s16_s10, [#allocation3], %s601_s19, %s601_s19, %s602_s20  }
  0x13   :  { %s603_s23 = smov [#allocation5]   ;;  %s550_s27 = scalar_lea.hbm %s674_s1, 6144 }
  0x14   :  { %s27_s24 = sshll.u32 %s603_s23, 4  ;;  %p551_p8 = scmp.ne.s32.totalorder %s674_s1, %s550_s27  ;;  %s28_s24 = int_to_ptr.vmem [resolvable:$true] %s27_s24 }
  0x15   :  { %p554_p9 = scmp.lt.u32.totalorder %s550_s27, %s674_s1 }
  0x17   :  { %p556_p10 = pnand %p554_p9, %p551_p8 }
  0x19   :  { %559 = shalt.err (!%p556_p10)
}
  0x1a   :  { %s560_s4 = scalar_lea.vmem %s28_s24, 6144  ;;  %p565_p12 = scmp.lt.s32.totalorder %s28_s24, %s28_s24 }
  0x1b   :  { %p561_p11 = scmp.ne.s32.totalorder %s28_s24, %s560_s4  ;;  %p566_p13 = scmp.lt.s32.totalorder %s560_s4, %s560_s4 }
  0x1d   :  { %p567_p0 = por %p566_p13, %p565_p12 }
  0x1f   :  { %p568_p1 = pnand %p567_p0, %p561_p11 }
  0x21   :  { %571 = shalt.err (!%p568_p1)
}
  0x22   :  { %s604_s0 = smov 384   ;;  %s605_s5 = smov 24  }
  0x23   :  { %33 = dma.hbm_to_vmem [thread:$0]  %s674_s1, 6144, %s28_s24, [#allocation6], %s604_s0, %s604_s0, %s605_s5  }
  0x24   :  { %594 = dma.done.wait [#allocation3], 256  }
  0x25   :  { %595 = vsyncadd [#allocation3], 4294967040 }
  0x26   :  { %596 = dma.done.wait [#allocation6], 6144  }
  0x27   :  { %597 = vsyncadd [#allocation6], 4294961152  ;;  %v606_v0 = vmov 0.0   ;;  %v43_v1 = vld [vmem:[#allocation5 + $0x8] sm:$0xff]  ;;  %v46_v2 = vld [vmem:[#allocation5 + $0x20] sm:$0xff]  ;;  %vm352_vm0 = vcmask 24576  }
  0x28   :  { %154 = vmatprep.mubr.f32.mxu0 %v606_v0  ;;  %v42_v3 = vld [vmem:[#allocation5] sm:$0xff]  ;;  %v428_v4 = vpack.c.bf16 %v46_v2, %v43_v1  ;;  %v45_v5 = vld [vmem:[#allocation5 + $0x18] sm:$0xff]  ;;  %v52_v7 = vld [vmem:[#allocation5 + $0x50] sm:$0xff]  ;;  %s609_s1 = smov [#allocation7]  }
  0x29   :  { %v49_v6 = vld [vmem:[#allocation5 + $0x38] sm:$0xff]  ;;  %v430_v8 = vpack.c.bf16 %v45_v5, %v42_v3  ;;  %v48_v10 = vld [vmem:[#allocation5 + $0x30] sm:$0xff]  ;;  %v51_v11 = vld [vmem:[#allocation5 + $0x48] sm:$0xff]  ;;  %s362_s8 = sshll.u32 %s609_s1, 4  ;;  %s363_s8 = int_to_ptr.vmem [resolvable:$true] %s362_s8 }
  0x2a   :  { %v432_v9 = vpack.c.bf16 %v52_v7, %v49_v6  ;;  %v55_v12 = vld [vmem:[#allocation5 + $0x68] sm:$0xff]  ;;  %429 = vmatprep.subr.bf16.mxu0 %v428_v4  ;;  %v58_v13 = vld [vmem:[#allocation5 + $0x80] sm:$0xff]  ;;  %v434_v14 = vpack.c.bf16 %v51_v11, %v48_v10  ;;  %v57_v17 = vld [vmem:[#allocation5 + $0x78] sm:$0xff]  ;;  %s572_s9 = scalar_lea.vmem %s363_s8, 64  ;;  %p577_p3 = scmp.lt.s32.totalorder %s363_s8, %s363_s8 }
  0x2b   :  { %431 = vmatpush1.bf16.msra.mxu0 %v430_v8  ;;  %v436_v15 = vpack.c.bf16 %v58_v13, %v55_v12  ;;  %v54_v16 = vld [vmem:[#allocation5 + $0x60] sm:$0xff]  ;;  %v61_v18 = vld [vmem:[#allocation5 + $0x98] sm:$0xff]  ;;  %v64_v19 = vld [vmem:[#allocation5 + $0xb0] sm:$0xff]  ;;  %v607_v12 = vmov 1   ;;  %v608_v13 = vmov 0   ;;  %p573_p2 = scmp.ne.s32.totalorder %s363_s8, %s572_s9  ;;  %p578_p4 = scmp.lt.s32.totalorder %s572_s9, %s572_s9 }
  0x2c   :  { %433 = vmatprep.subr.bf16.mxu0 %v432_v9  ;;  %v438_v20 = vpack.c.bf16 %v57_v17, %v54_v16  ;;  %v440_v21 = vpack.c.bf16 %v64_v19, %v61_v18  ;;  %v60_v22 = vld [vmem:[#allocation5 + $0x90] sm:$0xff]  ;;  %v63_v23 = vld [vmem:[#allocation5 + $0xa8] sm:$0xff]  ;;  %v70_v25 = vld [vmem:[#allocation5 + $0xe0] sm:$0xff]  ;;  %504 = vset.pattern.permute.xlu1 %v607_v12 }
  0x2d   :  { %v67_v24 = vld [vmem:[#allocation5 + $0xc8] sm:$0xff]  ;;  %v652_v26 = vld [vmem:[#allocation2] sm:$0xff]  ;;  %v442_v29 = vpack.c.bf16 %v63_v23, %v60_v22  ;;  %v66_v30 = vld [vmem:[#allocation5 + $0xc0] sm:$0xff]  ;;  %505 = vset.pattern.permute.xlu0 %v608_v13  ;;  %p579_p5 = por %p578_p4, %p577_p3 }
  0x2e   :  { %v44_v27 = vld [vmem:[#allocation5 + $0x10] sm:$0xff]  ;;  %v47_v28 = vld [vmem:[#allocation5 + $0x28] sm:$0xff]  ;;  %425 = vmatprep.mubr.f32.mxu1 %v652_v26  ;;  %v50_v32 = vld [vmem:[#allocation5 + $0x40] sm:$0xff]  ;;  %v444_v34 = vpack.c.bf16 %v70_v25, %v67_v24 }
  0x2f   :  { %435 = vmatpush1.bf16.msra.mxu0 %v434_v14  ;;  %v460_v31 = vpack.c.bf16 %v47_v28, %v44_v27  ;;  %v53_v33 = vld [vmem:[#allocation5 + $0x58] sm:$0xff]  ;;  %v56_v37 = vld [vmem:[#allocation5 + $0x70] sm:$0xff]  ;;  %v59_v38 = vld [vmem:[#allocation5 + $0x88] sm:$0xff]  ;;  %p580_p6 = pnand %p579_p5, %p573_p2 }
  0x30   :  { %437 = vmatprep.subr.bf16.mxu0 %v436_v15  ;;  %v69_v35 = vld [vmem:[#allocation5 + $0xd8] sm:$0xff]  ;;  %v464_v36 = vpack.c.bf16 %v53_v33, %v50_v32  ;;  %v76_v40 = vld [vmem:[#allocation5 + $0x110] sm:$0xff]  ;;  %v468_v43 = vpack.c.bf16 %v59_v38, %v56_v37  ;;  %v75_v45 = vld [vmem:[#allocation5 + $0x108] sm:$0xff] }
  0x31   :  { %v73_v39 = vld [vmem:[#allocation5 + $0xf8] sm:$0xff]  ;;  %461 = vmatprep.subr.bf16.mxu1 %v460_v31  ;;  %v446_v41 = vpack.c.bf16 %v69_v35, %v66_v30  ;;  %v72_v42 = vld [vmem:[#allocation5 + $0xf0] sm:$0xff]  ;;  %v62_v46 = vld [vmem:[#allocation5 + $0xa0] sm:$0xff] }
  0x32   :  { %463 = vmatpush3.bf16.msra.mxu1 %v460_v31  ;;  %v448_v44 = vpack.c.bf16 %v76_v40, %v73_v39  ;;  %v65_v47 = vld [vmem:[#allocation5 + $0xb8] sm:$0xff]  ;;  %v79_v48 = vld [vmem:[#allocation5 + $0x128] sm:$0xff]  ;;  %v82_v49 = vld [vmem:[#allocation5 + $0x140] sm:$0xff]  ;;  %v450_v50 = vpack.c.bf16 %v75_v45, %v72_v42 }
  0x33   :  { %439 = vmatpush1.bf16.msra.mxu0 %v438_v20  ;;  %465 = vmatprep.subr.bf16.mxu1 %v464_v36  ;;  %v78_v51 = vld [vmem:[#allocation5 + $0x120] sm:$0xff]  ;;  %v472_v52 = vpack.c.bf16 %v65_v47, %v62_v46  ;;  %v452_v53 = vpack.c.bf16 %v82_v49, %v79_v48  ;;  %v81_v54 = vld [vmem:[#allocation5 + $0x138] sm:$0xff]  ;;  %v68_v55 = vld [vmem:[#allocation5 + $0xd0] sm:$0xff] }
  0x34   :  { %441 = vmatprep.subr.bf16.mxu0 %v440_v21  ;;  %v71_v56 = vld [vmem:[#allocation5 + $0xe8] sm:$0xff]  ;;  %v85_v57 = vld [vmem:[#allocation5 + $0x158] sm:$0xff]  ;;  %v88_v58 = vld [vmem:[#allocation5 + $0x170] sm:$0xff]  ;;  %v454_v59 = vpack.c.bf16 %v81_v54, %v78_v51 }
  0x35   :  { %v84_v60 = vld [vmem:[#allocation5 + $0x150] sm:$0xff]  ;;  %v476_v61 = vpack.c.bf16 %v71_v56, %v68_v55  ;;  %v456_v62 = vpack.c.bf16 %v88_v58, %v85_v57  ;;  %v87_v63 = vld [vmem:[#allocation5 + $0x168] sm:$0xff]  ;;  %v74_v1 = vld [vmem:[#allocation5 + $0x100] sm:$0xff] }
  0x36   :  { %467 = vmatpush3.bf16.msra.mxu1 %v464_v36  ;;  %v77_v2 = vld [vmem:[#allocation5 + $0x118] sm:$0xff]  ;;  %v458_v3 = vpack.c.bf16 %v87_v63, %v84_v60  ;;  %v80_v5 = vld [vmem:[#allocation5 + $0x130] sm:$0xff]  ;;  %v83_v6 = vld [vmem:[#allocation5 + $0x148] sm:$0xff] }
  0x37   :  { %443 = vmatpush1.bf16.msra.mxu0 %v442_v29  ;;  %469 = vmatprep.subr.bf16.mxu1 %v468_v43  ;;  %v480_v4 = vpack.c.bf16 %v77_v2, %v74_v1  ;;  %v484_v7 = vpack.c.bf16 %v83_v6, %v80_v5  ;;  %v86_v8 = vld [vmem:[#allocation5 + $0x160] sm:$0xff]  ;;  %v89_v9 = vld [vmem:[#allocation5 + $0x178] sm:$0xff] }
  0x38   :  { %445 = vmatprep.subr.bf16.mxu0 %v444_v34  ;;  %v41_v10 = vld [vmem:[#allocation2 + $0x8] sm:$0xff]  ;;  %v488_v11 = vpack.c.bf16 %v89_v9, %v86_v8 }
  0x3a   :  { %471 = vmatpush3.bf16.msra.mxu1 %v468_v43 }
  0x3b   :  { %447 = vmatpush1.bf16.msra.mxu0 %v446_v41  ;;  %473 = vmatprep.subr.bf16.mxu1 %v472_v52 }
  0x3c   :  { %449 = vmatprep.subr.bf16.mxu0 %v448_v44 }
  0x3e   :  { %475 = vmatpush3.bf16.msra.mxu1 %v472_v52 }
  0x3f   :  { %451 = vmatpush1.bf16.msra.mxu0 %v450_v50  ;;  %477 = vmatprep.subr.bf16.mxu1 %v476_v61 }
  0x40   :  { %453 = vmatprep.subr.bf16.mxu0 %v452_v53 }
  0x42   :  { %479 = vmatpush3.bf16.msra.mxu1 %v476_v61 }
  0x43   :  { %455 = vmatpush1.bf16.msra.mxu0 %v454_v59  ;;  %481 = vmatprep.subr.bf16.mxu1 %v480_v4 }
  0x44   :  { %457 = vmatprep.subr.bf16.mxu0 %v456_v62 }
  0x46   :  { %483 = vmatpush3.bf16.msra.mxu1 %v480_v4 }
  0x47   :  { %459 = vmatpush1.bf16.msra.mxu0 %v458_v3  ;;  %485 = vmatprep.subr.bf16.mxu1 %v484_v7 }
  0x4a   :  { %155 = vmatmul.mubr.f32.vlgmr.msra.gmra.mrb[0].mxu0 %v652_v26  ;;  %487 = vmatpush3.bf16.msra.mxu1 %v484_v7 }
  0x4b   :  { %160 = vmatprep.mubr.f32.mxu0 %v606_v0  ;;  %489 = vmatprep.subr.bf16.mxu1 %v488_v11 }
  0x4e   :  { %161 = vmatmul.mubr.f32.gmra.mrb[2].mxu0 %v41_v10  ;;  %491 = vmatpush3.bf16.msra.mxu1 %v488_v11 }
  0x51   :  { %426 = vmatmul.mubr.f32.vlgmr.msra.gmra.mrb[0].mxu1 %v41_v10 }
 0x11d   :  { %v156_v14 = vpop.f32.mrb[0].mxu0 }
 0x11e   :  { %v158_v15 = vpop.f32.mrb[1].mxu0  ;;  %v242_v16 = vmul.f32 %v156_v14, %v156_v14 }
 0x120   :  { %244 = vadd.xlane.f32.xlu0 %v242_v16 }
 0x121   :  { %v162_v17 = vpop.f32.mrb[2].mxu0 }
 0x122   :  { %v243_v18 = vmul.f32 %v162_v17, %v162_v17  ;;  %v164_v19 = vpop.f32.mrb[3].mxu0 }
 0x124   :  { %246 = vadd.xlane.f32.xlu0 %v243_v18  ;;  %v427_v0 = vpop.f32.mrb[0].mxu1 }
 0x125   :  { %v233_v20 = vpop.f32.mrb[1].mxu1 }
 0x126   :  { %295 = vperm.xlu1 %504, %v233_v20  }
 0x12a   :  { %299 = vperm.xlu1 %504, %v427_v0  }
 0x12e   :  { %506 = vset.pattern.permute.xlu1 %v608_v13 }
 0x12f   :  { %277 = vperm.xlu1 %506, %v427_v0  }
 0x13a   :  { %272 = vperm.xlu0 %505, %v233_v20  }
 0x13e   :  { %507 = vset.pattern.permute.xlu0 %v607_v12 }
 0x1a5   :  { %v296_v30 = vpop.permute.xlu1 %295 }
 0x1a9   :  { %v300_v32 = vpop.permute.xlu1 %299 }
 0x1ad   :  { %v245_v21 = vpop.xlane.xlu0 %244 }
 0x1ae   :  { %508 = vrsqrt.f32 %v245_v21  ;;  %v278_v41 = vpop.permute.xlu1 %277 }
 0x1b1   :  { %v247_v22 = vpop.xlane.xlu0 %246 }
 0x1b2   :  { %510 = vrsqrt.f32 %v247_v22 }
 0x1b8   :  { %v509_v23 = vpop.eup %508 }
 0x1b9   :  { %v250_v24 = vmul.f32 %v509_v23, %v158_v15  ;;  %v273_v33 = vpop.permute.xlu0 %272 }
 0x1bb   :  { %v252_v25 = vmax.f32 %v250_v24, 0.0 }
 0x1bc   :  { %v511_v26 = vpop.eup %510 }
 0x1bd   :  { %v254_v27 = vmul.f32 1.442695, %v252_v25  ;;  %v251_v28 = vmul.f32 %v511_v26, %v164_v19 }
 0x1bf   :  { %512 = vpow2.f32 %v254_v27  ;;  %v253_v29 = vmax.f32 %v251_v28, 0.0 }
 0x1c1   :  { %v256_v31 = vmul.f32 1.442695, %v253_v29 }
 0x1c3   :  { %514 = vpow2.f32 %v256_v31 }
 0x1c9   :  { %v513_v34 = vpop.eup %512 }
 0x1ca   :  { %v258_v35 = vrot.slane %v513_v34, 4  ;;  %v302_v36 = vmul.f32 %v513_v34, %v296_v30  ;;  %v280_v37 = vmul.f32 %v513_v34, %v273_v33 }
 0x1cc   :  { %v259_v38 = vadd.f32 %v513_v34, %v258_v35  ;;  %v304_v39 = vrot.slane %v302_v36, 4  ;;  %v282_v40 = vrot.slane %v280_v37, 4 }
 0x1cd   :  { %v515_v42 = vpop.eup %514 }
 0x1ce   :  { %v260_v43 = vrot.slane %v259_v38, 2  ;;  %v264_v44 = vrot.slane %v515_v42, 4  ;;  %v303_v45 = vmul.f32 %v515_v42, %v300_v32  ;;  %v305_v46 = vadd.f32 %v304_v39, %v302_v36 }
 0x1cf   :  { %v283_v47 = vadd.f32 %v282_v40, %v280_v37  ;;  %v281_v48 = vmul.f32 %v515_v42, %v278_v41 }
 0x1d0   :  { %v261_v49 = vadd.f32 %v260_v43, %v259_v38  ;;  %v265_v50 = vadd.f32 %v515_v42, %v264_v44  ;;  %v310_v51 = vrot.slane %v303_v45, 4  ;;  %v306_v55 = vrot.slane %v305_v46, 2 }
 0x1d1   :  { %v288_v52 = vrot.slane %v281_v48, 4  ;;  %v284_v57 = vrot.slane %v283_v47, 2 }
 0x1d2   :  { %v262_v53 = vrot.slane %v261_v49, 1  ;;  %v266_v54 = vrot.slane %v265_v50, 2  ;;  %v311_v56 = vadd.f32 %v310_v51, %v303_v45  ;;  %v307_v62 = vadd.f32 %v306_v55, %v305_v46 }
 0x1d3   :  { %v289_v58 = vadd.f32 %v288_v52, %v281_v48  ;;  %v285_v1 = vadd.f32 %v284_v57, %v283_v47 }
 0x1d4   :  { %v263_v59 = vadd.f32 %v262_v53, %v261_v49  ;;  %v267_v60 = vadd.f32 %v266_v54, %v265_v50  ;;  %v312_v63 = vrot.slane %v311_v56, 2  ;;  %v308_v4 = vrot.slane %v307_v62, 1 }
 0x1d5   :  { %v290_v2 = vrot.slane %v289_v58, 2  ;;  %v286_v6 = vrot.slane %v285_v1, 1 }
 0x1d6   :  { %516 = vrcp.f32 %v263_v59  ;;  %v268_v61 = vrot.slane %v267_v60, 1  ;;  %v313_v5 = vadd.f32 %v312_v63, %v311_v56  ;;  %v309_v8 = vadd.f32 %v308_v4, %v307_v62 }
 0x1d7   :  { %v291_v7 = vadd.f32 %v290_v2, %v289_v58  ;;  %v287_v10 = vadd.f32 %v286_v6, %v285_v1 }
 0x1d8   :  { %v269_v3 = vadd.f32 %v268_v61, %v267_v60  ;;  %v314_v9 = vrot.slane %v313_v5, 1 }
 0x1d9   :  { %v292_v11 = vrot.slane %v291_v7, 1 }
 0x1da   :  { %518 = vrcp.f32 %v269_v3  ;;  %v315_v16 = vadd.f32 %v314_v9, %v313_v5 }
 0x1db   :  { %v293_v17 = vadd.f32 %v292_v11, %v291_v7 }
 0x1e0   :  { %v517_v12 = vpop.eup %516 }
 0x1e1   :  { %v320_v13 = vmul.f32 %v517_v12, %v309_v8  ;;  %v318_v14 = vmul.f32 %v517_v12, %v287_v10 }
 0x1e3   :  { %v324_v15 = vand.u32 2147483647, %v320_v13  ;;  %353 = vst.msk [vmem:[#allocation7] sm:$0x1] %vm352_vm0, %v318_v14  ;;  %v322_v37 = vmax.f32 %v320_v13, 0.0 }
 0x1e4   :  { %v519_v18 = vpop.eup %518 }
 0x1e5   :  { %v326_v19 = vsub.f32 0.0, %v324_v15  ;;  %v321_v0 = vmul.f32 %v519_v18, %v315_v16  ;;  %v319_v20 = vmul.f32 %v519_v18, %v293_v17 }
 0x1e7   :  { %v328_v21 = vmul.f32 1.442695, %v326_v19  ;;  %v325_v22 = vand.u32 2147483647, %v321_v0  ;;  %354 = vst.msk [vmem:[#allocation7 + $0x2] sm:$0x1] %vm352_vm0, %v319_v20 }
 0x1e8   :  { %v323_v44 = vmax.f32 %v321_v0, 0.0 }
 0x1e9   :  { %520 = vpow2.f32 %v328_v21  ;;  %v327_v23 = vsub.f32 0.0, %v325_v22 }
 0x1eb   :  { %v330_v24 = vmul.f32 1.442695, %v327_v23 }
 0x1ed   :  { %522 = vpow2.f32 %v330_v24 }
 0x1f3   :  { %v521_v25 = vpop.eup %520 }
 0x1f4   :  { %v332_v26 = vadd.f32 1.0, %v521_v25  ;;  %v335_v29 = vmul.f32 -0.5, %v521_v25  ;;  %v338_v32 = vand.u32 2147483647, %v521_v25 }
 0x1f6   :  { %524 = vlog2.f32 %v332_v26  ;;  %v336_v30 = vadd.f32 1.0, %v335_v29  ;;  %vm339_vm1 = vcmp.lt.f32.partialorder %v338_v32, 0.0004427343 }
 0x1f7   :  { %v523_v27 = vpop.eup %522 }
 0x1f8   :  { %v341_v28 = vadd.f32 1.0, %v523_v27  ;;  %v344_v31 = vmul.f32 -0.5, %v523_v27  ;;  %v337_v35 = vmul.f32 %v521_v25, %v336_v30  ;;  %v347_v38 = vand.u32 2147483647, %v523_v27 }
 0x1fa   :  { %526 = vlog2.f32 %v341_v28  ;;  %v345_v36 = vadd.f32 1.0, %v344_v31  ;;  %vm348_vm2 = vcmp.lt.f32.partialorder %v347_v38, 0.0004427343 }
 0x1fc   :  { %v346_v43 = vmul.f32 %v523_v27, %v345_v36 }
 0x200   :  { %v525_v33 = vpop.eup %524 }
 0x201   :  { %v334_v34 = vmul.f32 0.6931472, %v525_v33 }
 0x203   :  { %v340_v39 = vsel %vm339_vm1, %v337_v35, %v334_v34 }
 0x204   :  { %v527_v40 = vpop.eup %526  ;;  %v350_v41 = vadd.f32 %v340_v39, %v322_v37 }
 0x205   :  { %v343_v42 = vmul.f32 0.6931472, %v527_v40 }
 0x206   :  { %355 = vst.msk [vmem:[#allocation7 + $0x1] sm:$0x1] %vm352_vm0, %v350_v41 }
 0x207   :  { %v349_v45 = vsel %vm348_vm2, %v346_v43, %v343_v42 }
 0x208   :  { %v351_v46 = vadd.f32 %v349_v45, %v323_v44 }
 0x20a   :  { %356 = vst.msk [vmem:[#allocation7 + $0x3] sm:$0x1] %vm352_vm0, %v351_v46 }
 0x20b   :  { %583 = shalt.err (!%p580_p6)
}
 0x20c   :  { %s584_s12 = scalar_lea.hbm %s675_s2, 64 }
 0x20d   :  { %p585_p7 = scmp.ne.s32.totalorder %s675_s2, %s584_s12  ;;  %p588_p8 = scmp.lt.u32.totalorder %s584_s12, %s675_s2 }
 0x20f   :  { %p590_p9 = pnand %p588_p8, %p585_p7 }
 0x211   :  { %593 = shalt.err (!%p590_p9)
}
 0x212   :  { %s610_s17 = smov 32   ;;  %s611_s18 = smov 2  }
 0x213   :  { %368 = dma.vmem_to_hbm [thread:$0]  %s363_s8, 64, %s675_s2, [#allocation4], %s610_s17, %s610_s17, %s611_s18  }
 0x214   :  { %598 = dma.done.wait [#allocation4], 64  }
 0x215   :  { %599 = vsyncadd [#allocation4], 4294967232 }
 0x216   :  { %372 = vsyncpa [#allocation3], 1 }
 0x217   :  { %373 = vsyncpa [#allocation6], 1 }
 0x218   :  { %374 = vsyncpa [#allocation4], 1 }

</bundles_post_ra>
